<compile_context>
chip_gen: v5e
topology: v5e:2x2
jax: 0.10.0
libtpu: 0.0.40
codegen_flags: <defaults>
</compile_context>

<pallas_src>
import math
import numpy as np
import jax
import jax.numpy as jnp
from jax.experimental import pallas as pl
from jax.experimental.pallas import tpu as pltpu


def _round_up(x, m):
    return ((x + m - 1) // m) * m


def _vmem_capacity_bytes():
    """Physical VMEM per TensorCore; falls back to the smallest (v7x) value."""
    try:
        cap = getattr(pltpu.get_tpu_info(), "vmem_capacity_bytes", None)
        if cap:
            return int(cap)
    except Exception:
        pass
    return 64 * 1024 * 1024


def _resident_spec(shape):
    """Grid-invariant operand: constant index_map, single-buffered if supported."""
    try:
        return pl.BlockSpec(shape, lambda i: (0, 0), pipeline_mode=pl.Buffered(1))
    except TypeError:  # older BlockSpec signature without pipeline_mode
        return pl.BlockSpec(shape, lambda i: (0, 0))


def _pointwise_conv_silu_kernel(x_ref, w_ref, b_ref, o_ref):
    # x_ref: (TM, Cin) bf16   w_ref: (Cin, Cout4p) bf16   b_ref: (1, Cout4p) f32
    acc = jnp.dot(x_ref[...], w_ref[...], preferred_element_type=jnp.float32)
    acc = acc + b_ref[...]
    # SiLU; exp and the reciprocal both run on the EUP slot (free vs. VALU).
    sig = pl.reciprocal(1.0 + jnp.exp(-acc), approx=True)
    o_ref[...] = (acc * sig).astype(o_ref.dtype)


def pixel_shuffle_upsample_pallas(x, w, b, *, block_m=1024,
                                  compute_dtype=jnp.bfloat16,
                                  out_dtype=None, data_format="NCHW"):
    """Fused Conv2d(dim, dim_out*4, 1) + SiLU + PixelShuffle(2).

    x: (N, Cin, H, W) if data_format == "NCHW", else (N, H, W, Cin).
    w: (Cout4, Cin, 1, 1) OIHW.   b: (Cout4,).
    Returns (N, Cout4//4, 2H, 2W) for NCHW, or (N, 2H, 2W, Cout4//4) for NHWC.
    """
    assert data_format in ("NCHW", "NHWC")
    assert block_m % 8 == 0, "block_m must be a multiple of 8"
    if data_format == "NCHW":
        N, Cin, H, W = x.shape
    else:
        N, H, W, Cin = x.shape
    Cout4 = w.shape[0]
    assert Cout4 % 4 == 0 and w.shape[1] == Cin and w.shape[2] == w.shape[3] == 1
    Cout = Cout4 // 4
    M = N * H * W
    out_dtype = x.dtype if out_dtype is None else out_dtype

    # --- layout glue at the API boundary -------------------------------------
    # TODO(synk): the NCHW->channels-last flatten and the final PixelShuffle
    # interleave are pure layout copies with no compute; they stay in XLA
    # (pass data_format="NHWC" to avoid the channels-first transposes).
    if data_format == "NCHW":
        xm = jnp.transpose(x, (0, 2, 3, 1)).reshape(M, Cin)
    else:
        xm = x.reshape(M, Cin)
    xm = xm.astype(compute_dtype)

    # Fold the PixelShuffle channel permutation (c,2,2) -> (2,2,c) into the
    # weight/bias column order (free, one-time), and zero-pad Cout4 up to a
    # multiple of 128 for lane-dense output stores.
    perm = np.arange(Cout4).reshape(Cout, 4).T.reshape(-1)        # new col -> old col
    wm = jnp.transpose(w.reshape(Cout4, Cin)[perm, :]).astype(compute_dtype)
    bm = b[perm].astype(jnp.float32)
    Cout4p = _round_up(Cout4, 128)
    if Cout4p != Cout4:
        wm = jnp.pad(wm, ((0, 0), (0, Cout4p - Cout4)))
        bm = jnp.pad(bm, (0, Cout4p - Cout4))
    bm = bm.reshape(1, Cout4p)

    # --- TM selection: as big as the VMEM budget allows, >= 2 grid steps ------
    vmem_limit = max(32 * 1024 * 1024, int(_vmem_capacity_bytes() * 0.75))
    vmem_budget = int(vmem_limit * 0.80)          # headroom for compiler scratch
    out_itemsize = jnp.dtype(out_dtype).itemsize

    def _vmem_use(tm):
        in_tiles = 2 * tm * Cin * 2                        # bf16 x, double-buffered
        w_res = Cin * Cout4p * 2 + 8 * Cout4p * 4          # single-buffered w + bias
        out_tiles = 2 * tm * Cout4p * out_itemsize         # double-buffered output
        temps = 2 * tm * Cout4p * 4                        # f32 acc + sigmoid temps
        return in_tiles + w_res + out_tiles + temps

    if M <= 16:
        TM = M                                             # single full-size tile
    else:
        TM = min(block_m, _round_up(pl.cdiv(M, 2), 8), _round_up(M, 8))
        while TM > 8 and _vmem_use(TM) > vmem_budget:
            TM = _round_up(TM // 2, 8)
    grid_m = pl.cdiv(M, TM)

    bytes_acc = (M * Cin * 2 + Cin * Cout4p * 2 + Cout4p * 4
                 + M * Cout4p * out_itemsize)

    y = pl.pallas_call(
        _pointwise_conv_silu_kernel,
        out_shape=jax.ShapeDtypeStruct((M, Cout4p), out_dtype),
        grid=(grid_m,),
        in_specs=[
            pl.BlockSpec((TM, Cin), lambda i: (i, 0)),     # activations, streamed
            _resident_spec((Cin, Cout4p)),                 # weights, VMEM-resident
            _resident_spec((1, Cout4p)),                   # bias, VMEM-resident
        ],
        out_specs=pl.BlockSpec((TM, Cout4p), lambda i: (i, 0)),
        compiler_params=pltpu.CompilerParams(
            dimension_semantics=("parallel",),             # shards tiles across TCs
            vmem_limit_bytes=vmem_limit),
        cost_estimate=pl.CostEstimate(
            flops=2 * M * Cin * Cout4p,
            transcendentals=M * Cout4p,
            bytes_accessed=bytes_acc),
    )(xm, wm, bm)

    if Cout4p != Cout4:
        y = y[:, :Cout4]

    # --- PixelShuffle(2): columns already come out (i, j, c)-ordered ----------
    y = y.reshape(N, H, W, 2, 2, Cout)
    if data_format == "NCHW":
        y = jnp.transpose(y, (0, 5, 1, 3, 2, 4))           # (N, Cout, H, 2, W, 2)
        return y.reshape(N, Cout, 2 * H, 2 * W)
    y = jnp.transpose(y, (0, 1, 3, 2, 4, 5))               # (N, H, 2, W, 2, Cout)
    return y.reshape(N, 2 * H, 2 * W, Cout)


class PixelShuffleUpsamplePallas:
    """JAX/Pallas port of imagen_unet.PixelShuffleUpsample (forward pass)."""

    def __init__(self, dim, dim_out=None, key=None):
        dim_out = dim if dim_out is None else dim_out
        key = jax.random.PRNGKey(0) if key is None else key
        # init_conv_: kaiming_uniform_ on (dim_out, dim, 1, 1) (a=0 -> gain sqrt(2)),
        # each output channel repeated 4x ('o ... -> (o 4) ...'), zero bias.
        fan_in = dim * 1 * 1
        bound = math.sqrt(2.0) * math.sqrt(3.0 / fan_in)
        w0 = jax.random.uniform(key, (dim_out, dim, 1, 1), jnp.float32, -bound, bound)
        self.w = jnp.repeat(w0, 4, axis=0)       # (dim_out*4, dim, 1, 1)
        self.b = jnp.zeros((dim_out * 4,), jnp.float32)
        self.dim, self.dim_out = dim, dim_out

    def __call__(self, x):
        return pixel_shuffle_upsample_pallas(x, self.w, self.b)


def _reference_forward(w, b, x, compute_dtype=jnp.bfloat16):
    """Pure-JAX (lax.conv + SiLU + pixel shuffle) reference for validation."""
    y = jax.lax.conv_general_dilated(
        x.astype(compute_dtype), w.astype(compute_dtype),
        window_strides=(1, 1), padding="VALID",
        dimension_numbers=("NCHW", "OIHW", "NCHW"),
        preferred_element_type=jnp.float32)
    y = y + b.reshape(1, -1, 1, 1)
    y = y * (1.0 / (1.0 + jnp.exp(-y)))          # exact SiLU
    N, C4, H, W = y.shape
    C = C4 // 4
    y = y.reshape(N, C, 2, 2, H, W)
    y = jnp.transpose(y, (0, 1, 4, 2, 5, 3))     # (N, C, H, 2, W, 2)
    return y.reshape(N, C, 2 * H, 2 * W).astype(x.dtype)


if __name__ == "__main__":
    key = jax.random.PRNGKey(0)
    k_x, k_p = jax.random.split(key)

    # small shapes: batch=2, dim=4, spatial=16x16 -> output (2, 4, 32, 32)
    x = jax.random.normal(k_x, (2, 4, 16, 16), jnp.float32)
    layer = PixelShuffleUpsamplePallas(dim=4, dim_out=None, key=k_p)

    out = jax.block_until_ready(layer(x))
    assert out.shape == (2, 4, 32, 32), out.shape

    ref = jax.block_until_ready(_reference_forward(layer.w, layer.b, x))
    # Tolerance covers bf16 MXU inputs + the EUP approx-reciprocal sigmoid.
    np.testing.assert_allclose(np.asarray(out), np.asarray(ref), rtol=1e-2, atol=1e-2)

    print("KERNEL_OK")
</pallas_src>

<mosaic_0001>
module attributes {stable_mosaic.version = 11 : i64} {
  func.func @_pointwise_conv_silu_kernel(%arg0: i32, %arg1: memref<256x4xbf16, #tpu.memory_space<vmem>>, %arg2: memref<4x128xbf16, #tpu.memory_space<vmem>>, %arg3: memref<1x128xf32, #tpu.memory_space<vmem>>, %arg4: memref<256x128xf32, #tpu.memory_space<vmem>>) attributes {dimension_semantics = [#tpu.dimension_semantics<parallel>], iteration_bounds = array<i64: 2>, scalar_prefetch = 0 : i64, scratch_operands = 0 : i64, tpu.core_type = #tpu.core_type<tc>, window_params = [{transform_indices = @transform_0, window_bounds = array<i64: 256, 4>}, {pipeline_mode = #tpu.pipeline_mode<synchronous>, transform_indices = @transform_1, window_bounds = array<i64: 4, 128>}, {pipeline_mode = #tpu.pipeline_mode<synchronous>, transform_indices = @transform_2, window_bounds = array<i64: 1, 128>}, {transform_indices = @transform_3, window_bounds = array<i64: 256, 128>}]} {
    %c0 = arith.constant 0 : index
    %c0_0 = arith.constant 0 : index
    %0 = vector.load %arg1[%c0, %c0_0] : memref<256x4xbf16, #tpu.memory_space<vmem>>, vector<256x4xbf16>
    %c0_1 = arith.constant 0 : index
    %c0_2 = arith.constant 0 : index
    %1 = vector.load %arg2[%c0_1, %c0_2] : memref<4x128xbf16, #tpu.memory_space<vmem>>, vector<4x128xbf16>
    %cst = arith.constant dense<0.000000e+00> : vector<256x128xf32>
    %2 = tpu.matmul %0, %1, %cst {dimension_numbers = #tpu.dot_dimension_numbers<[1], [0], [0], [1], [0, 0, 1, 1], [], []>} : vector<256x4xbf16>, vector<4x128xbf16>, vector<256x128xf32> -> vector<256x128xf32>
    %c0_3 = arith.constant 0 : index
    %c0_4 = arith.constant 0 : index
    %3 = vector.load %arg3[%c0_3, %c0_4] : memref<1x128xf32, #tpu.memory_space<vmem>>, vector<1x128xf32>
    %4 = vector.broadcast %3 : vector<1x128xf32> to vector<256x128xf32>
    %5 = arith.addf %2, %4 : vector<256x128xf32>
    %cst_5 = arith.constant 0.000000e+00 : f32
    %6 = vector.broadcast %cst_5 : f32 to vector<256x128xf32>
    %7 = arith.subf %6, %5 : vector<256x128xf32>
    %8 = math.exp %7 : vector<256x128xf32>
    %cst_6 = arith.constant 1.000000e+00 : f32
    %9 = vector.broadcast %cst_6 : f32 to vector<256x128xf32>
    %10 = arith.addf %9, %8 : vector<256x128xf32>
    %11 = tpu.reciprocal %10 {approx = true} : vector<256x128xf32> -> vector<256x128xf32>
    %12 = arith.mulf %5, %11 : vector<256x128xf32>
    %c0_7 = arith.constant 0 : index
    %c0_8 = arith.constant 0 : index
    %13 = vector.load %arg4[%c0_7, %c0_8] : memref<256x128xf32, #tpu.memory_space<vmem>>, vector<256x128xf32>
    tpu.vector_store %arg4[%c0_7, %c0_8], %12 {strides = array<i32>} : memref<256x128xf32, #tpu.memory_space<vmem>>, vector<256x128xf32>,
    return
  }
  func.func @transform_0(%arg0: i32) -> (i32, i32) {
    %c0_i32 = arith.constant 0 : i32
    %c0_i32_0 = arith.constant 0 : i32
    return %arg0, %c0_i32 : i32, i32
  }
  func.func @transform_1(%arg0: i32) -> (i32, i32) {
    %c0_i32 = arith.constant 0 : i32
    %c0_i32_0 = arith.constant 0 : i32
    %c0_i32_1 = arith.constant 0 : i32
    return %c0_i32, %c0_i32_0 : i32, i32
  }
  func.func @transform_2(%arg0: i32) -> (i32, i32) {
    %c0_i32 = arith.constant 0 : i32
    %c0_i32_0 = arith.constant 0 : i32
    %c0_i32_1 = arith.constant 0 : i32
    return %c0_i32, %c0_i32_0 : i32, i32
  }
  func.func @transform_3(%arg0: i32) -> (i32, i32) {
    %c0_i32 = arith.constant 0 : i32
    %c0_i32_0 = arith.constant 0 : i32
    return %arg0, %c0_i32 : i32, i32
  }
}

</mosaic_0001>

<bundles_post_ra>
// kernel: tpu_custom_call.1
= control target key start
LH: loop header
LB: loop body
LE: loop exit
PB: predicated region body
PF: predicated region fallthrough
CT: control target
= control target key end

     0   :  { %8 = vsyncpa [#allocation3], 0  ;;  %s1405_s0 = inlined_call_operand.vmem [shape: bf16[512,4], index: 0, kind: input, shape index: {}]   ;;  %s1406_s1 = inlined_call_operand.vmem [shape: bf16[4,128], index: 1, kind: input, shape index: {}]   ;;  %s1407_s2 = inlined_call_operand.vmem [shape: f32[1,128], index: 2, kind: input, shape index: {}]   ;;  %s1408_s3 = inlined_call_operand.hbm [shape: f32[512,128], index: 3, kind: output, shape index: {}]  }
   0x1   :  { %10 = vsyncpa [#allocation3 + $0x1], 0  ;;  %s1102_s12 = smov 0   ;;  %s1104_s13 = smov 0  }
   0x2   :  { %s1106_s14 = smov 0   ;;  %s1108_s15 = smov 0  }
   0x3 LB: > { %s1123_s16 = sadd.s32 4294967295, %s1078_s15   ;;  %s734_s17 = sadd.s32 4294967294, %s1078_s15   ;;  %s1078_s15 = sphi %s1108_s15, %s1414_s15   ;;  %s1074_s14 = sphi %s1106_s14, %s1413_s14   ;;  %s1070_s13 = sphi %s1104_s13, %s1412_s13   ;;  %s1066_s12 = sphi %s1102_s12, %s1411_s12  }
   0x4   : > { %s1127_s18 = sadd.s32 1, %s1078_s15   ;;  %s91_s19 = sadd.s32 1, %s1074_s14 }
   0x5   : > { %s88_s20 = ssub.s32 %s1078_s15, %s1127_s18  ;;  %p101_p0 = scmp.ne.s32.totalorder %s1074_s14, %s1070_s13 }
   0x6   : > { %p89_p1 = scmp.eq.s32.totalorder %s88_s20, 0  ;;  %p102_p2 = scmp.eq.s32.totalorder %s1123_s16, 1 }
   0x7   : > { %p107_p3 = scmp.ne.s32.totalorder %s1070_s13, %s1066_s12  ;;  %p108_p4 = scmp.eq.s32.totalorder %s734_s17, 1 }
   0x8   : > { %s1138_s21 = scalar_select %p89_p1, %s1074_s14, %s91_s19  }
   0x9   : > { %p1140_p5 = por %p102_p2, %p101_p0  ;;  %p1144_p6 = por %p108_p4, %p107_p3 }
   0xa   : > { %p737_p7 = scmp.ge.s32.totalorder %s1078_s15, 1  ;;  %p141_p8 = scmp.lt.s32.totalorder %s1078_s15, 3 }
   0xc   : > { %p142_p9 = pnand %p737_p7, %p141_p8 }
   0xd   : > { %s739_s26 = sshll.u32 (!%p142_p9), %s1123_s16, 5  ;;  %s162_s6 = sand.u32 (!%p142_p9), 1, %s1070_s13  }
   0xe   : > { %145 = sbr.rel (%p142_p9) target bundleno = 248 (0xf8), region = 32  ;;  %p166_p10 = scmp.lt.s32.totalorder (!%p142_p9), %s739_s26, 63 }
   0xf   : > { %s738_s7 = sshll.u32 (!%p142_p9), %s162_s6, 8  ;;  %s842_s9 = sshll.u32 (!%p142_p9), %s1123_s16, 8 }
  0x10   : > { %s1225_s8 = scalar_lea.vmem (!%p142_p9), [#allocation2], %s738_s7  ;;  %s668_s17 = scalar_lea.hbm (!%p142_p9), %s1408_s3, %s842_s9 }
  0x11   : > { %s669_s19 = sshll.u32 (!%p142_p9), %s1225_s8, 4  ;;  %s671_s16 = sshll.u32 (!%p142_p9), %s668_s17, 4  ;;  %s670_s19 = int_to_ptr.vmem [resolvable:$true] %s669_s19  ;;  %s672_s16 = int_to_ptr.hbm [resolvable:$true] %s671_s16 }
  0x12   : > { %s657_s20 = scalar_lea.sflag (!%p142_p9), [#allocation3], %s162_s6  ;;  %s1030_s24 = sshra.s32 (!%p142_p9), %s672_s16, 4  ;;  %s1031_s24 = int_to_ptr.hbm [resolvable:$true] %s1030_s24 }
  0x13   : > { %v205_v0 = vld [vmem:[%s1406_s1] sm:$0x3]  ;;  %vm339_vm0 = vcmask 1041408   ;;  %s1416_s26 = smov (!%p166_p10, %s739_s26), 63  ;;  %vm290_vm1 = vcmask 31744   ;;  %s1032_s25 = scalar_lea.hbm %s1031_s24, 256 }
  0x14   : > { %v341_v1 = vsel %vm339_vm0, %v205_v0, 0  ;;  %s740_s27 = sshll.u32 %s1416_s26, 2  ;;  %v1176_v18 = vld [vmem:[%s1407_s2] ss:$0 sm:$0xff]  ;;  %p1033_p11 = scmp.ne.s32.totalorder %s1031_s24, %s1032_s25 }
  0x15   : > { %350 = vmatpush.bf16.msra.mxu0 %v341_v1  ;;  %843 = vmatpush.bf16.msra.mxu1 %v341_v1  ;;  %s169_s30 = scalar_lea.vmem %s1405_s0, %s740_s27  ;;  %s1036_s28 = scalar_lea.hbm %s1408_s3, 512 }
  0x16   : > { %844 = vmatpush.bf16.msra.mxu2 %v341_v1  ;;  %845 = vmatpush.bf16.msra.mxu3 %v341_v1  ;;  %v826_v2 = vld [vmem:[%s169_s30] sm:$0xff]  ;;  %v827_v6 = vld [vmem:[%s169_s30 + $0x8] sm:$0xff]  ;;  %v828_v10 = vld [vmem:[%s169_s30 + $0x10] sm:$0xff]  ;;  %p1034_p12 = pnand %p1033_p11, %p1140_p5  ;;  %p1037_p0 = scmp.lt.s32.totalorder %s1031_s24, %s1408_s3 }
  0x17   : > { %v830_v3 = vld [vmem:[%s169_s30 + $0x20] sm:$0xff]  ;;  %v831_v7 = vld [vmem:[%s169_s30 + $0x28] sm:$0xff]  ;;  %v832_v11 = vld [vmem:[%s169_s30 + $0x30] sm:$0xff]  ;;  %p1038_p1 = scmp.lt.s32.totalorder %s1036_s28, %s1032_s25 }
  0x18   : > { %v834_v4 = vld [vmem:[%s169_s30 + $0x40] sm:$0xff]  ;;  %805 = vmatmul.msk.bf16.vlgmr.msra.gmra.mxu0 %vm290_vm1, %v826_v2  ;;  %809 = vmatmul.msk.bf16.vlgmr.msra.gmra.mxu1 %vm290_vm1, %v830_v3  ;;  %v835_v8 = vld [vmem:[%s169_s30 + $0x48] sm:$0xff]  ;;  %v836_v12 = vld [vmem:[%s169_s30 + $0x50] sm:$0xff]  ;;  %p1035_p13 = pneg %p1034_p12 }
  0x19   : > { %v838_v5 = vld [vmem:[%s169_s30 + $0x60] sm:$0xff]  ;;  %813 = vmatmul.msk.bf16.vlgmr.msra.gmra.mxu2 %vm290_vm1, %v834_v4  ;;  %v839_v9 = vld [vmem:[%s169_s30 + $0x68] sm:$0xff]  ;;  %v840_v13 = vld [vmem:[%s169_s30 + $0x70] sm:$0xff]  ;;  %p1039_p2 = por %p1038_p1, %p1037_p0 }
  0x1a   : > { %817 = vmatmul.msk.bf16.vlgmr.msra.gmra.mxu3 %vm290_vm1, %v838_v5  ;;  %v829_v14 = vld [vmem:[%s169_s30 + $0x18] sm:$0xff] }
  0x1b   : > { %v833_v15 = vld [vmem:[%s169_s30 + $0x38] sm:$0xff]  ;;  %p1040_p3 = pnand %p1039_p2, %p1035_p13 }
  0x1c   : > { %v837_v16 = vld [vmem:[%s169_s30 + $0x58] sm:$0xff] }
  0x1d   : > { %v841_v17 = vld [vmem:[%s169_s30 + $0x78] sm:$0xff] }
  0x28   : > { %806 = vmatmul.msk.bf16.gmra.mxu0 %vm290_vm1, %v827_v6  ;;  %810 = vmatmul.msk.bf16.gmra.mxu1 %vm290_vm1, %v831_v7 }
  0x29   : > { %814 = vmatmul.msk.bf16.gmra.mxu2 %vm290_vm1, %v835_v8 }
  0x2a   : > { %818 = vmatmul.msk.bf16.gmra.mxu3 %vm290_vm1, %v839_v9 }
  0x38   : > { %807 = vmatmul.msk.bf16.gmra.mxu0 %vm290_vm1, %v828_v10  ;;  %811 = vmatmul.msk.bf16.gmra.mxu1 %vm290_vm1, %v832_v11 }
  0x39   : > { %815 = vmatmul.msk.bf16.gmra.mxu2 %vm290_vm1, %v836_v12 }
  0x3a   : > { %819 = vmatmul.msk.bf16.gmra.mxu3 %vm290_vm1, %v840_v13 }
  0x48   : > { %808 = vmatmul.msk.bf16.gmra.mxu0 %vm290_vm1, %v829_v14  ;;  %812 = vmatmul.msk.bf16.gmra.mxu1 %vm290_vm1, %v833_v15 }
  0x49   : > { %816 = vmatmul.msk.bf16.gmra.mxu2 %vm290_vm1, %v837_v16 }
  0x4a   : > { %820 = vmatmul.msk.bf16.gmra.mxu3 %vm290_vm1, %v841_v17 }
  0x95   : > { %v352_v19 = vpop.f32.mrf.mxu0  ;;  %v372_v20 = vpop.f32.mrf.mxu1 }
  0x96   : > { %v353_v21 = vadd.f32 %v1176_v18, %v352_v19  ;;  %v1180_v22 = vadd.f32 %v1176_v18, %v372_v20 }
  0x98   : > { %v432_v23 = vsub.f32 0.0, %v353_v21  ;;  %v440_v24 = vsub.f32 0.0, %v1180_v22 }
  0x9a   : > { %v464_v25 = vmul.f32 1.442695, %v432_v23  ;;  %v480_v26 = vmul.f32 1.442695, %v440_v24 }
  0x9c   : > { %888 = vpow2.f32 %v464_v25  ;;  %v392_v27 = vpop.f32.mrf.mxu2 }
  0x9d   : > { %v412_v28 = vpop.f32.mrf.mxu3  ;;  %890 = vpow2.f32 %v480_v26  ;;  %v1184_v29 = vadd.f32 %v1176_v18, %v392_v27  ;;  %v354_v31 = vpop.f32.mrf.mxu0 }
  0x9e   : > { %v1187_v30 = vadd.f32 %v1176_v18, %v412_v28  ;;  %v374_v32 = vpop.f32.mrf.mxu1  ;;  %v1190_v33 = vadd.f32 %v1176_v18, %v354_v31 }
  0x9f   : > { %v1193_v34 = vadd.f32 %v1176_v18, %v374_v32  ;;  %v448_v35 = vsub.f32 0.0, %v1184_v29 }
  0xa0   : > { %v456_v36 = vsub.f32 0.0, %v1187_v30  ;;  %v433_v37 = vsub.f32 0.0, %v1190_v33 }
  0xa1   : > { %v441_v38 = vsub.f32 0.0, %v1193_v34  ;;  %v496_v39 = vmul.f32 1.442695, %v448_v35 }
  0xa2   : > { %v512_v40 = vmul.f32 1.442695, %v456_v36  ;;  %v889_v41 = vpop.eup %888  ;;  %v466_v44 = vmul.f32 1.442695, %v433_v37 }
  0xa3   : > { %v891_v42 = vpop.eup %890  ;;  %v528_v43 = vadd.f32 1.0, %v889_v41  ;;  %892 = vpow2.f32 %v496_v39  ;;  %v482_v46 = vmul.f32 1.442695, %v441_v38 }
  0xa4   : > { %v536_v45 = vadd.f32 1.0, %v891_v42  ;;  %894 = vpow2.f32 %v512_v40  ;;  %v394_v47 = vpop.f32.mrf.mxu2 }
  0xa5   : > { %v414_v48 = vpop.f32.mrf.mxu3  ;;  %896 = vrcp.f32 %v528_v43  ;;  %v1201_v49 = vadd.f32 %v1176_v18, %v394_v47  ;;  %v357_v51 = vpop.f32.mrf.mxu0 }
  0xa6   : > { %v1204_v50 = vadd.f32 %v1176_v18, %v414_v48  ;;  %v377_v52 = vpop.f32.mrf.mxu1  ;;  %898 = vrcp.f32 %v536_v45  ;;  %v1207_v53 = vadd.f32 %v1176_v18, %v357_v51 }
  0xa7   : > { %v1210_v54 = vadd.f32 %v1176_v18, %v377_v52  ;;  %900 = vpow2.f32 %v466_v44  ;;  %v449_v55 = vsub.f32 0.0, %v1201_v49 }
  0xa8   : > { %v457_v56 = vsub.f32 0.0, %v1204_v50  ;;  %902 = vpow2.f32 %v482_v46  ;;  %v434_v57 = vsub.f32 0.0, %v1207_v53 }
  0xa9   : > { %v442_v58 = vsub.f32 0.0, %v1210_v54  ;;  %v893_v59 = vpop.eup %892  ;;  %v498_v60 = vmul.f32 1.442695, %v449_v55 }
  0xaa   : > { %v895_v61 = vpop.eup %894  ;;  %v544_v62 = vadd.f32 1.0, %v893_v59  ;;  %v514_v63 = vmul.f32 1.442695, %v457_v56  ;;  %v468_v2 = vmul.f32 1.442695, %v434_v57 }
  0xab   : > { %v897_v0 = vpop.eup %896  ;;  %v552_v1 = vadd.f32 1.0, %v895_v61  ;;  %904 = vpow2.f32 %v498_v60  ;;  %v484_v5 = vmul.f32 1.442695, %v442_v58 }
  0xac   : > { %v899_v3 = vpop.eup %898  ;;  %v592_v4 = vmul.f32 %v897_v0, %v353_v21  ;;  %906 = vrcp.f32 %v544_v62  ;;  %v397_v6 = vpop.f32.mrf.mxu2 }
  0xad   : > { %v417_v7 = vpop.f32.mrf.mxu3  ;;  %v901_v8 = vpop.eup %900  ;;  %v600_v9 = vmul.f32 %v899_v3, %v1180_v22  ;;  %908 = vrcp.f32 %v552_v1  ;;  %v1220_v10 = vadd.f32 %v1176_v18, %v397_v6 }
  0xae   : > { %v1223_v11 = vadd.f32 %v1176_v18, %v417_v7  ;;  %v359_v12 = vpop.f32.mrf.mxu0  ;;  %v379_v13 = vpop.f32.mrf.mxu1  ;;  %624 = vst [vmem:[%s1225_s8] sm:$0xff] %v592_v4  ;;  %v529_v15 = vadd.f32 1.0, %v901_v8  ;;  %910 = vpow2.f32 %v514_v63 }
  0xaf   : > { %v903_v14 = vpop.eup %902  ;;  %v1229_v16 = vadd.f32 %v1176_v18, %v359_v12  ;;  %v1232_v17 = vadd.f32 %v1176_v18, %v379_v13  ;;  %632 = vst [vmem:[%s1225_s8 + $0x40] sm:$0xff] %v600_v9  ;;  %912 = vpow2.f32 %v468_v2  ;;  %v450_v20 = vsub.f32 0.0, %v1220_v10 }
  0xb0   : > { %v537_v19 = vadd.f32 1.0, %v903_v14  ;;  %v458_v21 = vsub.f32 0.0, %v1223_v11  ;;  %914 = vrcp.f32 %v529_v15 }
  0xb1   : > { %v435_v22 = vsub.f32 0.0, %v1229_v16  ;;  %v443_v23 = vsub.f32 0.0, %v1232_v17  ;;  %v905_v24 = vpop.eup %904  ;;  %v500_v25 = vmul.f32 1.442695, %v450_v20 }
  0xb2   : > { %916 = vrcp.f32 %v537_v19  ;;  %v516_v26 = vmul.f32 1.442695, %v458_v21  ;;  %v907_v27 = vpop.eup %906  ;;  %v545_v28 = vadd.f32 1.0, %v905_v24 }
  0xb3   : > { %918 = vpow2.f32 %v484_v5  ;;  %v470_v31 = vmul.f32 1.442695, %v435_v22  ;;  %v909_v32 = vpop.eup %908  ;;  %v608_v35 = vmul.f32 %v907_v27, %v1184_v29  ;;  %v486_v38 = vmul.f32 1.442695, %v443_v23 }
  0xb4   : > { %920 = vpow2.f32 %v500_v25  ;;  %v911_v36 = vpop.eup %910  ;;  %v616_v37 = vmul.f32 %v909_v32, %v1187_v30  ;;  %v399_v39 = vpop.f32.mrf.mxu2 }
  0xb5   : > { %922 = vrcp.f32 %v545_v28  ;;  %v419_v40 = vpop.f32.mrf.mxu3  ;;  %v913_v41 = vpop.eup %912  ;;  %640 = vst [vmem:[%s1225_s8 + $0x80] sm:$0xff] %v608_v35  ;;  %v553_v42 = vadd.f32 1.0, %v911_v36  ;;  %v1243_v43 = vadd.f32 %v1176_v18, %v399_v39 }
  0xb6   : > { %924 = vpow2.f32 %v516_v26  ;;  %v1246_v44 = vadd.f32 %v1176_v18, %v419_v40  ;;  %v362_v29 = vpop.f32.mrf.mxu0  ;;  %v382_v45 = vpop.f32.mrf.mxu1  ;;  %648 = vst [vmem:[%s1225_s8 + $0xc0] sm:$0xff] %v616_v37  ;;  %v530_v30 = vadd.f32 1.0, %v913_v41 }
  0xb7   : > { %v915_v46 = vpop.eup %914  ;;  %926 = vpow2.f32 %v470_v31  ;;  %v1250_v47 = vadd.f32 %v1176_v18, %v362_v29  ;;  %v1253_v48 = vadd.f32 %v1176_v18, %v382_v45  ;;  %v451_v55 = vsub.f32 0.0, %v1243_v43 }
  0xb8   : > { %v917_v51 = vpop.eup %916  ;;  %v593_v52 = vmul.f32 %v915_v46, %v1190_v33  ;;  %928 = vrcp.f32 %v553_v42  ;;  %v459_v56 = vsub.f32 0.0, %v1246_v44 }
  0xb9   : > { %v919_v57 = vpop.eup %918  ;;  %v601_v58 = vmul.f32 %v917_v51, %v1193_v34  ;;  %930 = vrcp.f32 %v530_v30  ;;  %v436_v59 = vsub.f32 0.0, %v1250_v47  ;;  %v444_v60 = vsub.f32 0.0, %v1253_v48 }
  0xba   : > { %v921_v61 = vpop.eup %920  ;;  %625 = vst [vmem:[%s1225_s8 + $0x8] sm:$0xff] %v593_v52  ;;  %v538_v62 = vadd.f32 1.0, %v919_v57  ;;  %932 = vpow2.f32 %v486_v38  ;;  %v502_v63 = vmul.f32 1.442695, %v451_v55  ;;  %v518_v3 = vmul.f32 1.442695, %v459_v56 }
  0xbb   : > { %v923_v33 = vpop.eup %922  ;;  %633 = vst [vmem:[%s1225_s8 + $0x48] sm:$0xff] %v601_v58  ;;  %v546_v0 = vadd.f32 1.0, %v921_v61  ;;  %v472_v5 = vmul.f32 1.442695, %v436_v59  ;;  %v488_v6 = vmul.f32 1.442695, %v444_v60 }
  0xbc   : > { %v925_v1 = vpop.eup %924  ;;  %v609_v2 = vmul.f32 %v923_v33, %v1201_v49  ;;  %934 = vrcp.f32 %v538_v62  ;;  %v402_v7 = vpop.f32.mrf.mxu2 }
  0xbd   : > { %v927_v34 = vpop.eup %926  ;;  %936 = vrcp.f32 %v546_v0  ;;  %v554_v4 = vadd.f32 1.0, %v925_v1  ;;  %v422_v8 = vpop.f32.mrf.mxu3  ;;  %v1266_v13 = vadd.f32 %v1176_v18, %v402_v7 }
  0xbe   : > { %v929_v9 = vpop.eup %928  ;;  %641 = vst [vmem:[%s1225_s8 + $0x88] sm:$0xff] %v609_v2  ;;  %v531_v12 = vadd.f32 1.0, %v927_v34  ;;  %938 = vpow2.f32 %v502_v63  ;;  %v1269_v14 = vadd.f32 %v1176_v18, %v422_v8  ;;  %v364_v49 = vpop.f32.mrf.mxu0 }
  0xbf   : > { %v384_v15 = vpop.f32.mrf.mxu1  ;;  %v931_v19 = vpop.eup %930  ;;  %v617_v20 = vmul.f32 %v929_v9, %v1204_v50  ;;  %940 = vrcp.f32 %v554_v4  ;;  %v1273_v21 = vadd.f32 %v1176_v18, %v364_v49  ;;  %v452_v25 = vsub.f32 0.0, %v1266_v13 }
  0xc0   : > { %v1276_v22 = vadd.f32 %v1176_v18, %v384_v15  ;;  %v933_v23 = vpop.eup %932  ;;  %v594_v24 = vmul.f32 %v931_v19, %v1207_v53  ;;  %942 = vrcp.f32 %v531_v12  ;;  %v460_v26 = vsub.f32 0.0, %v1269_v14 }
  0xc1   : > { %649 = vst [vmem:[%s1225_s8 + $0xc8] sm:$0xff] %v617_v20  ;;  %v539_v27 = vadd.f32 1.0, %v933_v23  ;;  %944 = vpow2.f32 %v518_v3  ;;  %v437_v50 = vsub.f32 0.0, %v1273_v21  ;;  %v504_v32 = vmul.f32 1.442695, %v452_v25 }
  0xc2   : > { %v445_v28 = vsub.f32 0.0, %v1276_v22  ;;  %v935_v31 = vpop.eup %934  ;;  %626 = vst [vmem:[%s1225_s8 + $0x10] sm:$0xff] %v594_v24  ;;  %946 = vpow2.f32 %v472_v5  ;;  %v520_v35 = vmul.f32 1.442695, %v460_v26 }
  0xc3   : > { %v937_v53 = vpop.eup %936  ;;  %v602_v36 = vmul.f32 %v935_v31, %v1210_v54  ;;  %948 = vrcp.f32 %v539_v27  ;;  %v474_v39 = vmul.f32 1.442695, %v437_v50 }
  0xc4   : > { %v939_v37 = vpop.eup %938  ;;  %v610_v38 = vmul.f32 %v937_v53, %v1220_v10  ;;  %950 = vpow2.f32 %v488_v6  ;;  %v490_v42 = vmul.f32 1.442695, %v445_v28  ;;  %v404_v29 = vpop.f32.mrf.mxu2 }
  0xc5   : > { %v941_v40 = vpop.eup %940  ;;  %634 = vst [vmem:[%s1225_s8 + $0x50] sm:$0xff] %v602_v36  ;;  %v547_v41 = vadd.f32 1.0, %v939_v37  ;;  %952 = vpow2.f32 %v504_v32  ;;  %v424_v45 = vpop.f32.mrf.mxu3  ;;  %v1291_v54 = vadd.f32 %v1176_v18, %v404_v29 }
  0xc6   : > { %v943_v46 = vpop.eup %942  ;;  %642 = vst [vmem:[%s1225_s8 + $0x90] sm:$0xff] %v610_v38  ;;  %v618_v30 = vmul.f32 %v941_v40, %v1223_v11  ;;  %954 = vpow2.f32 %v520_v35  ;;  %v1294_v10 = vadd.f32 %v1176_v18, %v424_v45  ;;  %v367_v51 = vpop.f32.mrf.mxu0 }
  0xc7   : > { %v387_v52 = vpop.f32.mrf.mxu1  ;;  %v945_v55 = vpop.eup %944  ;;  %v595_v56 = vmul.f32 %v943_v46, %v1229_v16  ;;  %956 = vrcp.f32 %v547_v41  ;;  %v1298_v57 = vadd.f32 %v1176_v18, %v367_v51  ;;  %v453_v60 = vsub.f32 0.0, %v1291_v54 }
  0xc8   : > { %v1301_v58 = vadd.f32 %v1176_v18, %v387_v52  ;;  %v947_v11 = vpop.eup %946  ;;  %650 = vst [vmem:[%s1225_s8 + $0xd0] sm:$0xff] %v618_v30  ;;  %v555_v59 = vadd.f32 1.0, %v945_v55  ;;  %958 = vpow2.f32 %v474_v39  ;;  %v461_v61 = vsub.f32 0.0, %v1294_v10 }
  0xc9   : > { %v949_v62 = vpop.eup %948  ;;  %627 = vst [vmem:[%s1225_s8 + $0x18] sm:$0xff] %v595_v56  ;;  %v532_v63 = vadd.f32 1.0, %v947_v11  ;;  %960 = vpow2.f32 %v490_v42  ;;  %v438_v16 = vsub.f32 0.0, %v1298_v57  ;;  %v506_v2 = vmul.f32 1.442695, %v453_v60 }
  0xca   : > { %v446_v33 = vsub.f32 0.0, %v1301_v58  ;;  %v951_v0 = vpop.eup %950  ;;  %v603_v1 = vmul.f32 %v949_v62, %v1232_v17  ;;  %962 = vrcp.f32 %v555_v59  ;;  %v522_v6 = vmul.f32 1.442695, %v461_v61 }
  0xcb   : > { %v953_v3 = vpop.eup %952  ;;  %964 = vrcp.f32 %v532_v63  ;;  %v540_v34 = vadd.f32 1.0, %v951_v0  ;;  %v476_v9 = vmul.f32 1.442695, %v438_v16 }
  0xcc   : > { %v955_v4 = vpop.eup %954  ;;  %635 = vst [vmem:[%s1225_s8 + $0x58] sm:$0xff] %v603_v1  ;;  %v548_v5 = vadd.f32 1.0, %v953_v3  ;;  %966 = vpow2.f32 %v506_v2  ;;  %v492_v12 = vmul.f32 1.442695, %v446_v33  ;;  %v407_v49 = vpop.f32.mrf.mxu2 }
  0xcd   : > { %v957_v7 = vpop.eup %956  ;;  %968 = vrcp.f32 %v540_v34  ;;  %v556_v8 = vadd.f32 1.0, %v955_v4  ;;  %v427_v15 = vpop.f32.mrf.mxu3  ;;  %v1313_v20 = vadd.f32 %v1176_v18, %v407_v49 }
  0xce   : > { %v959_v19 = vpop.eup %958  ;;  %v611_v17 = vmul.f32 %v957_v7, %v1243_v43  ;;  %970 = vrcp.f32 %v548_v5  ;;  %v1316_v23 = vadd.f32 %v1176_v18, %v427_v15  ;;  %v369_v24 = vpop.f32.mrf.mxu0 }
  0xcf   : > { %v389_v25 = vpop.f32.mrf.mxu1  ;;  %v961_v26 = vpop.eup %960  ;;  %972 = vrcp.f32 %v556_v8  ;;  %v533_v27 = vadd.f32 1.0, %v959_v19  ;;  %v1319_v50 = vadd.f32 %v1176_v18, %v369_v24  ;;  %v454_v32 = vsub.f32 0.0, %v1313_v20 }
  0xd0   : > { %v1322_v28 = vadd.f32 %v1176_v18, %v389_v25  ;;  %v963_v31 = vpop.eup %962  ;;  %643 = vst [vmem:[%s1225_s8 + $0x98] sm:$0xff] %v611_v17  ;;  %v541_v43 = vadd.f32 1.0, %v961_v26  ;;  %974 = vpow2.f32 %v522_v6  ;;  %v462_v35 = vsub.f32 0.0, %v1316_v23 }
  0xd1   : > { %v965_v53 = vpop.eup %964  ;;  %v619_v36 = vmul.f32 %v963_v31, %v1246_v44  ;;  %976 = vrcp.f32 %v533_v27  ;;  %v439_v37 = vsub.f32 0.0, %v1319_v50  ;;  %v508_v41 = vmul.f32 1.442695, %v454_v32 }
  0xd2   : > { %v447_v38 = vsub.f32 0.0, %v1322_v28  ;;  %v967_v39 = vpop.eup %966  ;;  %v596_v40 = vmul.f32 %v965_v53, %v1250_v47  ;;  %978 = vrcp.f32 %v541_v43  ;;  %v524_v45 = vmul.f32 1.442695, %v462_v35 }
  0xd3   : > { %v969_v42 = vpop.eup %968  ;;  %651 = vst [vmem:[%s1225_s8 + $0xd8] sm:$0xff] %v619_v36  ;;  %v549_v29 = vadd.f32 1.0, %v967_v39  ;;  %980 = vpow2.f32 %v476_v9  ;;  %v478_v30 = vmul.f32 1.442695, %v439_v37 }
  0xd4   : > { %v971_v46 = vpop.eup %970  ;;  %628 = vst [vmem:[%s1225_s8 + $0x20] sm:$0xff] %v596_v40  ;;  %v604_v44 = vmul.f32 %v969_v42, %v1253_v48  ;;  %982 = vpow2.f32 %v492_v12  ;;  %v494_v47 = vmul.f32 1.442695, %v447_v38  ;;  %v409_v55 = vpop.f32.mrf.mxu2 }
  0xd5   : > { %v973_v51 = vpop.eup %972  ;;  %v612_v52 = vmul.f32 %v971_v46, %v1266_v13  ;;  %984 = vrcp.f32 %v549_v29  ;;  %v429_v56 = vpop.f32.mrf.mxu3  ;;  %v1338_v60 = vadd.f32 %v1176_v18, %v409_v55 }
  0xd6   : > { %v975_v11 = vpop.eup %974  ;;  %636 = vst [vmem:[%s1225_s8 + $0x60] sm:$0xff] %v604_v44  ;;  %v620_v59 = vmul.f32 %v973_v51, %v1269_v14  ;;  %986 = vpow2.f32 %v508_v41  ;;  %v1341_v48 = vadd.f32 %v1176_v18, %v429_v56 }
  0xd7   : > { %v977_v61 = vpop.eup %976  ;;  %644 = vst [vmem:[%s1225_s8 + $0xa0] sm:$0xff] %v612_v52  ;;  %v557_v13 = vadd.f32 1.0, %v975_v11  ;;  %988 = vpow2.f32 %v524_v45  ;;  %v455_v14 = vsub.f32 0.0, %v1338_v60 }
  0xd8   : > { %v979_v62 = vpop.eup %978  ;;  %652 = vst [vmem:[%s1225_s8 + $0xe0] sm:$0xff] %v620_v59  ;;  %v597_v63 = vmul.f32 %v977_v61, %v1273_v21  ;;  %990 = vpow2.f32 %v478_v30  ;;  %v463_v2 = vsub.f32 0.0, %v1341_v48 }
  0xd9   : > { %v981_v16 = vpop.eup %980  ;;  %v605_v33 = vmul.f32 %v979_v62, %v1276_v22  ;;  %992 = vrcp.f32 %v557_v13  ;;  %v510_v1 = vmul.f32 1.442695, %v455_v14 }
  0xda   : > { %v983_v0 = vpop.eup %982  ;;  %629 = vst [vmem:[%s1225_s8 + $0x28] sm:$0xff] %v597_v63  ;;  %v534_v18 = vadd.f32 1.0, %v981_v16  ;;  %994 = vpow2.f32 %v494_v47  ;;  %v526_v8 = vmul.f32 1.442695, %v463_v2 }
  0xdb   : > { %v985_v3 = vpop.eup %984  ;;  %637 = vst [vmem:[%s1225_s8 + $0x68] sm:$0xff] %v605_v33  ;;  %v542_v34 = vadd.f32 1.0, %v983_v0 }
  0xdc   : > { %v987_v4 = vpop.eup %986  ;;  %v613_v21 = vmul.f32 %v985_v3, %v1291_v54  ;;  %996 = vrcp.f32 %v534_v18 }
  0xdd   : > { %v989_v5 = vpop.eup %988  ;;  %998 = vrcp.f32 %v542_v34  ;;  %v550_v22 = vadd.f32 1.0, %v987_v4 }
  0xde   : > { %v991_v6 = vpop.eup %990  ;;  %645 = vst [vmem:[%s1225_s8 + $0xa8] sm:$0xff] %v613_v21  ;;  %v558_v7 = vadd.f32 1.0, %v989_v5  ;;  %1000 = vpow2.f32 %v510_v1 }
  0xdf   : > { %v993_v9 = vpop.eup %992  ;;  %1002 = vrcp.f32 %v550_v22  ;;  %v535_v12 = vadd.f32 1.0, %v991_v6 }
  0xe0   : > { %v995_v49 = vpop.eup %994  ;;  %v621_v15 = vmul.f32 %v993_v9, %v1294_v10  ;;  %1004 = vrcp.f32 %v558_v7 }
  0xe1   : > { %1006 = vrcp.f32 %v535_v12  ;;  %v543_v54 = vadd.f32 1.0, %v995_v49 }
  0xe2   : > { %v997_v19 = vpop.eup %996  ;;  %653 = vst [vmem:[%s1225_s8 + $0xe8] sm:$0xff] %v621_v15  ;;  %1008 = vpow2.f32 %v526_v8 }
  0xe3   : > { %v999_v17 = vpop.eup %998  ;;  %v598_v24 = vmul.f32 %v997_v19, %v1298_v57  ;;  %1010 = vrcp.f32 %v543_v54 }
  0xe4   : > { %v1001_v25 = vpop.eup %1000  ;;  %v606_v26 = vmul.f32 %v999_v17, %v1301_v58 }
  0xe5   : > { %v1003_v27 = vpop.eup %1002  ;;  %630 = vst [vmem:[%s1225_s8 + $0x30] sm:$0xff] %v598_v24  ;;  %v551_v10 = vadd.f32 1.0, %v1001_v25 }
  0xe6   : > { %v1005_v31 = vpop.eup %1004  ;;  %638 = vst [vmem:[%s1225_s8 + $0x70] sm:$0xff] %v606_v26  ;;  %v614_v43 = vmul.f32 %v1003_v27, %v1313_v20 }
  0xe7   : > { %v1007_v32 = vpop.eup %1006  ;;  %v622_v35 = vmul.f32 %v1005_v31, %v1316_v23  ;;  %1012 = vrcp.f32 %v551_v10 }
  0xe8   : > { %v1009_v57 = vpop.eup %1008  ;;  %646 = vst [vmem:[%s1225_s8 + $0xb0] sm:$0xff] %v614_v43  ;;  %v599_v53 = vmul.f32 %v1007_v32, %v1319_v50 }
  0xe9   : > { %v1011_v58 = vpop.eup %1010  ;;  %654 = vst [vmem:[%s1225_s8 + $0xf0] sm:$0xff] %v622_v35  ;;  %v559_v36 = vadd.f32 1.0, %v1009_v57 }
  0xea   : > { %631 = vst [vmem:[%s1225_s8 + $0x38] sm:$0xff] %v599_v53  ;;  %v607_v37 = vmul.f32 %v1011_v58, %v1322_v28 }
  0xeb   : > { %1014 = vrcp.f32 %v559_v36 }
  0xec   : > { %639 = vst [vmem:[%s1225_s8 + $0x78] sm:$0xff] %v607_v37 }
  0xed   : > { %v1013_v20 = vpop.eup %1012 }
  0xee   : > { %v615_v23 = vmul.f32 %v1013_v20, %v1338_v60 }
  0xf0   : > { %647 = vst [vmem:[%s1225_s8 + $0xb8] sm:$0xff] %v615_v23 }
  0xf1   : > { %v1015_v50 = vpop.eup %1014 }
  0xf2   : > { %v623_v38 = vmul.f32 %v1015_v50, %v1341_v48 }
  0xf4   : > { %655 = vst [vmem:[%s1225_s8 + $0xf8] sm:$0xff] %v623_v38 }
  0xf5   : > { %1043 = shalt.err (!%p1040_p3)
}
  0xf6   : > { %s1080_s4 = smov 128   ;;  %s1081_s5 = smov 8  }
  0xf7   : > { %846 = dma.vmem_to_hbm [thread:$0]  (%p1140_p5), %s670_s19, 4096, %s672_s16, %s657_s20, %s1080_s4, %s1080_s4, %s1081_s5  }
  0xf8 PF: > { %p852_p4 = scmp.ge.s32.totalorder %s1078_s15, 2  ;;  %s686_s6 = sand.u32 1, %s1066_s12  }
  0xf9   : > { %s687_s7 = scalar_lea.sflag [#allocation3], %s686_s6 }
  0xfa   : > { %p849_p7 = pnand %p852_p4, %p1144_p6 }
  0xfc   : > { %p850_p8 = pneg %p849_p7 }
  0xfe   : > { %1061 = dma.done.wait (%p850_p8), %s687_s7, 4096  }
  0xff   : > { %1063 = vsyncadd (%p850_p8), %s687_s7, 4294963200  ;;  %p13_p9 = scmp.ge.s32.totalorder %s1127_s18, 4   ;;  %s1411_s12 = smov %s1070_s13 }
 0x100   : > { %s1412_s13 = smov %s1074_s14  ;;  %s1413_s14 = smov %s1138_s21 }
 0x101   : > { %s1414_s15 = smov %s1127_s18  ;;  %15 = sbr.rel (!%p13_p9) target bundleno = 3 (0x3), region = 67 }
 0x106   :  { %693 = vsyncpa [#allocation3], 1 }
 0x107   :  { %695 = vsyncpa [#allocation3 + $0x1], 1 }

</bundles_post_ra>
